<compile_context>
chip_gen: v7x
topology: tpu7x:2x2x1
jax: 0.10.0
libtpu: 0.0.40
codegen_flags: <defaults>
</compile_context>

<pallas_src>
import numpy as np
import jax
import jax.numpy as jnp
from jax.experimental import pallas as pl
from jax.experimental.pallas import tpu as pltpu

# ----- problem sizes (small, consistent with the module) -----
N = 2            # batch
C_IN = 4         # input channels
T = 16           # frames
V = 16           # vertices / spatial width
C_OUT = 32       # out_channels
K = 5            # kernel_size (temporal)
STRIDE = 1       # module default
DILATION = 1     # module default
PAD = (K + (K - 1) * (DILATION - 1) - 1) // 2
T_OUT = (T + 2 * PAD - DILATION * (K - 1) - 1) // STRIDE + 1

TV = T * V                 # 256 input lanes per (n, c) row
TV_OUT = T_OUT * V         # 256 output lanes per (n, c) row
BN_CNT = N * T_OUT * V     # BN normalization count (per channel)
BN_EPS = 1e-5
W_COLS = K * C_IN + 2      # packed slab: [w2d | gamma | beta]


# ----------------------------------------------------------------------------
# Pallas kernel: in-kernel pad + im2col (values) + MXU matmul + fused train-BN
# ----------------------------------------------------------------------------
def temporal_conv_kernel(x_ref, wp_ref, out_ref):
    # x_ref  : (N*C_IN, T*V)       rows (n, c), lanes (t, v)   [free reshape of NCHW x]
    # wp_ref : (C_OUT, K*C_IN + 2) cols [0:K*C_IN]=w2d, then gamma, beta
    # out_ref: (N*C_OUT, T_OUT*V)  rows (n, c), lanes (t, v)   [free reshape to NCHW out]
    wp = wp_ref[...]
    w = wp[:, 0:K * C_IN]                       # (C_OUT, K*C_IN)
    gamma = wp[:, K * C_IN:K * C_IN + 1]        # (C_OUT, 1)
    beta = wp[:, K * C_IN + 1:K * C_IN + 2]     # (C_OUT, 1)

    x = x_ref[...]                              # (N*C_IN, T*V)
    zpad = jnp.zeros((C_IN, PAD * V), jnp.float32)

    # Per-batch im2col kept entirely in vregs; one MXU call per batch element.
    ys = []
    for n in range(N):
        xn = x[n * C_IN:(n + 1) * C_IN, :]                       # (C_IN, T*V)
        xp = jnp.concatenate([zpad, xn, zpad], axis=1)           # (C_IN, (T+2P)*V)
        xcol = jnp.concatenate(
            [xp[:, k * DILATION * V:k * DILATION * V + TV_OUT] for k in range(K)],
            axis=0)                                              # (K*C_IN, T_OUT*V)
        ys.append(jnp.dot(w, xcol, preferred_element_type=jnp.float32))
    y = jnp.concatenate(ys, axis=0)                              # (N*C_OUT, T_OUT*V)

    # Conv bias omitted: with training-mode BN (batch stats over all N,T,V
    # positions) a per-channel constant cancels exactly in the mean
    # subtraction, so the add is dead work.
    # TODO(synk): reinstate bias + running-stat updates if eval-mode BN is needed.

    # BatchNorm2d (training mode), one-pass stats; the N sublane blocks of a
    # channel all contribute to that channel's statistics.
    inv_cnt = jnp.float32(1.0 / BN_CNT)
    s1 = jnp.sum(y, axis=1, keepdims=True)                       # (N*C_OUT, 1)
    s2 = jnp.sum(y * y, axis=1, keepdims=True)                   # (N*C_OUT, 1)
    s1c = s1[0:C_OUT]
    s2c = s2[0:C_OUT]
    for n in range(1, N):
        s1c = s1c + s1[n * C_OUT:(n + 1) * C_OUT]
        s2c = s2c + s2[n * C_OUT:(n + 1) * C_OUT]
    mean = s1c * inv_cnt
    var = s2c * inv_cnt - mean * mean                            # biased (PyTorch BN norm)
    inv_std = jax.lax.rsqrt(var + BN_EPS)

    # fused affine: y * scale + shift
    scale = gamma * inv_std                                      # (C_OUT, 1)
    shift = beta - mean * scale                                  # (C_OUT, 1)
    scale_full = jnp.concatenate([scale] * N, axis=0)            # (N*C_OUT, 1)
    shift_full = jnp.concatenate([shift] * N, axis=0)
    out_ref[...] = (y * scale_full + shift_full).astype(out_ref.dtype)


# ----------------------------------------------------------------------------
# Init-time constant packing (module parameters)
# ----------------------------------------------------------------------------
def pack_weights(W, gamma, beta):
    # W: (C_OUT, C_IN, K, 1) -> w2d[o, k*C_IN + c] = W[o, c, k, 0]
    w2d = jnp.transpose(W[..., 0].astype(jnp.float32),
                        (0, 2, 1)).reshape(C_OUT, K * C_IN)
    return jnp.concatenate(
        [w2d,
         gamma.reshape(C_OUT, 1).astype(jnp.float32),
         beta.reshape(C_OUT, 1).astype(jnp.float32)], axis=1)    # (C_OUT, K*C_IN+2)


# ----------------------------------------------------------------------------
# Forward wrapper (jitted): only free reshapes around the pallas_call
# ----------------------------------------------------------------------------
@jax.jit
def temporal_conv_forward(x, w_packed):
    # x: (N, C_IN, T, V) -> row-major reshape (no copy, no transpose)
    x2d = x.astype(jnp.float32).reshape(N * C_IN, TV)

    out = pl.pallas_call(
        temporal_conv_kernel,
        out_shape=jax.ShapeDtypeStruct((N * C_OUT, TV_OUT), jnp.float32),
        grid_spec=pltpu.PrefetchScalarGridSpec(
            num_scalar_prefetch=0,
            grid=(1,),
            in_specs=[
                pl.BlockSpec((N * C_IN, TV), lambda i: (0, 0)),
                pl.BlockSpec((C_OUT, W_COLS), lambda i: (0, 0)),
            ],
            out_specs=pl.BlockSpec((N * C_OUT, TV_OUT), lambda i: (0, 0)),
        ),
        compiler_params=pltpu.CompilerParams(
            dimension_semantics=("arbitrary",)),
    )(x2d, w_packed)

    # rows are (n, c), lanes are (t, v): free reshape, no transpose needed
    return out.reshape(N, C_OUT, T_OUT, V)


# ----------------------------------------------------------------------------
# Pure-JAX reference (mirrors the PyTorch forward, training-mode BN, with bias)
# ----------------------------------------------------------------------------
def reference(x, W, bias, gamma, beta):
    y = jax.lax.conv_general_dilated(
        x.astype(jnp.float32), W.astype(jnp.float32),
        window_strides=(STRIDE, 1),
        padding=((PAD, PAD), (0, 0)),
        rhs_dilation=(DILATION, 1),
        dimension_numbers=('NCHW', 'OIHW', 'NCHW'))
    y = y + bias.reshape(1, C_OUT, 1, 1)
    mean = jnp.mean(y, axis=(0, 2, 3), keepdims=True)
    var = jnp.var(y, axis=(0, 2, 3), keepdims=True)     # biased, as in BN train
    y = (y - mean) / jnp.sqrt(var + BN_EPS)
    return gamma.reshape(1, C_OUT, 1, 1) * y + beta.reshape(1, C_OUT, 1, 1)


if __name__ == "__main__":
    key = jax.random.PRNGKey(0)
    kx, kw, kb, kg, kbe = jax.random.split(key, 5)

    x = jax.random.normal(kx, (N, C_IN, T, V), dtype=jnp.float32)
    W = 0.3 * jax.random.normal(kw, (C_OUT, C_IN, K, 1), dtype=jnp.float32)
    bias = 0.1 * jax.random.normal(kb, (C_OUT,), dtype=jnp.float32)
    gamma = 1.0 + 0.2 * jax.random.normal(kg, (C_OUT,), dtype=jnp.float32)
    beta = 0.1 * jax.random.normal(kbe, (C_OUT,), dtype=jnp.float32)

    # constant packing hoisted to init (bias deliberately not packed: it is
    # algebraically cancelled by training-mode BN)
    w_packed = pack_weights(W, gamma, beta)

    y = temporal_conv_forward(x, w_packed)
    y = jax.block_until_ready(y)

    y_ref = reference(x, W, bias, gamma, beta)
    err = float(jnp.max(jnp.abs(y - y_ref)))
    assert np.isfinite(err) and err < 1e-4, f"kernel/reference mismatch: {err}"
    print("KERNEL_OK")
</pallas_src>

<mosaic_0001>
module attributes {stable_mosaic.version = 11 : i64} {
  func.func @temporal_conv_kernel(%arg0: i32, %arg1: memref<8x256xf32, #tpu.memory_space<vmem>>, %arg2: memref<32x22xf32, #tpu.memory_space<vmem>>, %arg3: memref<64x256xf32, #tpu.memory_space<vmem>>) attributes {dimension_semantics = [#tpu.dimension_semantics<arbitrary>], iteration_bounds = array<i64: 1>, scalar_prefetch = 0 : i64, scratch_operands = 0 : i64, tpu.core_type = #tpu.core_type<tc>, window_params = [{pipeline_mode = #tpu.pipeline_mode<synchronous>, transform_indices = @transform_0, window_bounds = array<i64: 8, 256>}, {pipeline_mode = #tpu.pipeline_mode<synchronous>, transform_indices = @transform_1, window_bounds = array<i64: 32, 22>}, {pipeline_mode = #tpu.pipeline_mode<synchronous>, transform_indices = @transform_2, window_bounds = array<i64: 64, 256>}]} {
    %c0 = arith.constant 0 : index
    %c0_0 = arith.constant 0 : index
    %0 = vector.load %arg2[%c0, %c0_0] : memref<32x22xf32, #tpu.memory_space<vmem>>, vector<32x22xf32>
    %1 = vector.extract_strided_slice %0 {offsets = [0, 0], sizes = [32, 20], strides = [1, 1]} : vector<32x22xf32> to vector<32x20xf32>
    %2 = vector.extract_strided_slice %0 {offsets = [0, 20], sizes = [32, 1], strides = [1, 1]} : vector<32x22xf32> to vector<32x1xf32>
    %3 = vector.extract_strided_slice %0 {offsets = [0, 21], sizes = [32, 1], strides = [1, 1]} : vector<32x22xf32> to vector<32x1xf32>
    %c0_1 = arith.constant 0 : index
    %c0_2 = arith.constant 0 : index
    %4 = vector.load %arg1[%c0_1, %c0_2] : memref<8x256xf32, #tpu.memory_space<vmem>>, vector<8x256xf32>
    %cst = arith.constant 0.000000e+00 : f32
    %5 = vector.broadcast %cst : f32 to vector<4x32xf32>
    %6 = vector.extract_strided_slice %4 {offsets = [0, 0], sizes = [4, 256], strides = [1, 1]} : vector<8x256xf32> to vector<4x256xf32>
    %7 = tpu.concatenate %5, %6, %5 in 1 : vector<4x32xf32>, vector<4x256xf32>, vector<4x32xf32> -> vector<4x320xf32>
    %8 = vector.extract_strided_slice %7 {offsets = [0, 0], sizes = [4, 256], strides = [1, 1]} : vector<4x320xf32> to vector<4x256xf32>
    %9 = vector.extract_strided_slice %7 {offsets = [0, 16], sizes = [4, 256], strides = [1, 1]} : vector<4x320xf32> to vector<4x256xf32>
    %10 = vector.extract_strided_slice %7 {offsets = [0, 32], sizes = [4, 256], strides = [1, 1]} : vector<4x320xf32> to vector<4x256xf32>
    %11 = vector.extract_strided_slice %7 {offsets = [0, 48], sizes = [4, 256], strides = [1, 1]} : vector<4x320xf32> to vector<4x256xf32>
    %12 = vector.extract_strided_slice %7 {offsets = [0, 64], sizes = [4, 256], strides = [1, 1]} : vector<4x320xf32> to vector<4x256xf32>
    %13 = tpu.concatenate %8, %9, %10, %11, %12 in 0 : vector<4x256xf32>, vector<4x256xf32>, vector<4x256xf32>, vector<4x256xf32>, vector<4x256xf32> -> vector<20x256xf32>
    %cst_3 = arith.constant dense<0.000000e+00> : vector<32x256xf32>
    %14 = tpu.matmul %1, %13, %cst_3 {dimension_numbers = #tpu.dot_dimension_numbers<[1], [0], [0], [1], [0, 0, 1, 1], [], []>} : vector<32x20xf32>, vector<20x256xf32>, vector<32x256xf32> -> vector<32x256xf32>
    %15 = vector.extract_strided_slice %4 {offsets = [4, 0], sizes = [4, 256], strides = [1, 1]} : vector<8x256xf32> to vector<4x256xf32>
    %16 = tpu.concatenate %5, %15, %5 in 1 : vector<4x32xf32>, vector<4x256xf32>, vector<4x32xf32> -> vector<4x320xf32>
    %17 = vector.extract_strided_slice %16 {offsets = [0, 0], sizes = [4, 256], strides = [1, 1]} : vector<4x320xf32> to vector<4x256xf32>
    %18 = vector.extract_strided_slice %16 {offsets = [0, 16], sizes = [4, 256], strides = [1, 1]} : vector<4x320xf32> to vector<4x256xf32>
    %19 = vector.extract_strided_slice %16 {offsets = [0, 32], sizes = [4, 256], strides = [1, 1]} : vector<4x320xf32> to vector<4x256xf32>
    %20 = vector.extract_strided_slice %16 {offsets = [0, 48], sizes = [4, 256], strides = [1, 1]} : vector<4x320xf32> to vector<4x256xf32>
    %21 = vector.extract_strided_slice %16 {offsets = [0, 64], sizes = [4, 256], strides = [1, 1]} : vector<4x320xf32> to vector<4x256xf32>
    %22 = tpu.concatenate %17, %18, %19, %20, %21 in 0 : vector<4x256xf32>, vector<4x256xf32>, vector<4x256xf32>, vector<4x256xf32>, vector<4x256xf32> -> vector<20x256xf32>
    %cst_4 = arith.constant dense<0.000000e+00> : vector<32x256xf32>
    %23 = tpu.matmul %1, %22, %cst_4 {dimension_numbers = #tpu.dot_dimension_numbers<[1], [0], [0], [1], [0, 0, 1, 1], [], []>} : vector<32x20xf32>, vector<20x256xf32>, vector<32x256xf32> -> vector<32x256xf32>
    %24 = tpu.concatenate %14, %23 in 0 : vector<32x256xf32>, vector<32x256xf32> -> vector<64x256xf32>
    %cst_5 = arith.constant dense<0.000000e+00> : vector<64xf32>
    %25 = vector.multi_reduction <add>, %24, %cst_5 [1] : vector<64x256xf32> to vector<64xf32>
    %26 = vector.shape_cast %25 : vector<64xf32> to vector<64x1xf32>
    %27 = arith.mulf %24, %24 : vector<64x256xf32>
    %cst_6 = arith.constant dense<0.000000e+00> : vector<64xf32>
    %28 = vector.multi_reduction <add>, %27, %cst_6 [1] : vector<64x256xf32> to vector<64xf32>
    %29 = vector.shape_cast %28 : vector<64xf32> to vector<64x1xf32>
    %30 = vector.extract_strided_slice %26 {offsets = [0, 0], sizes = [32, 1], strides = [1, 1]} : vector<64x1xf32> to vector<32x1xf32>
    %31 = vector.extract_strided_slice %29 {offsets = [0, 0], sizes = [32, 1], strides = [1, 1]} : vector<64x1xf32> to vector<32x1xf32>
    %32 = vector.extract_strided_slice %26 {offsets = [32, 0], sizes = [32, 1], strides = [1, 1]} : vector<64x1xf32> to vector<32x1xf32>
    %33 = arith.addf %30, %32 : vector<32x1xf32>
    %34 = vector.extract_strided_slice %29 {offsets = [32, 0], sizes = [32, 1], strides = [1, 1]} : vector<64x1xf32> to vector<32x1xf32>
    %35 = arith.addf %31, %34 : vector<32x1xf32>
    %cst_7 = arith.constant 0.001953125 : f32
    %36 = vector.broadcast %cst_7 : f32 to vector<32x1xf32>
    %37 = arith.mulf %33, %36 : vector<32x1xf32>
    %cst_8 = arith.constant 0.001953125 : f32
    %38 = vector.broadcast %cst_8 : f32 to vector<32x1xf32>
    %39 = arith.mulf %35, %38 : vector<32x1xf32>
    %40 = arith.mulf %37, %37 : vector<32x1xf32>
    %41 = arith.subf %39, %40 : vector<32x1xf32>
    %cst_9 = arith.constant 9.99999974E-6 : f32
    %42 = vector.broadcast %cst_9 : f32 to vector<32x1xf32>
    %43 = arith.addf %41, %42 : vector<32x1xf32>
    %44 = math.rsqrt %43 : vector<32x1xf32>
    %45 = arith.mulf %2, %44 : vector<32x1xf32>
    %46 = arith.mulf %37, %45 : vector<32x1xf32>
    %47 = arith.subf %3, %46 : vector<32x1xf32>
    %48 = tpu.concatenate %45, %45 in 0 : vector<32x1xf32>, vector<32x1xf32> -> vector<64x1xf32>
    %49 = tpu.concatenate %47, %47 in 0 : vector<32x1xf32>, vector<32x1xf32> -> vector<64x1xf32>
    %50 = vector.broadcast %48 : vector<64x1xf32> to vector<64x256xf32>
    %51 = arith.mulf %24, %50 : vector<64x256xf32>
    %52 = vector.broadcast %49 : vector<64x1xf32> to vector<64x256xf32>
    %53 = arith.addf %51, %52 : vector<64x256xf32>
    %c0_10 = arith.constant 0 : index
    %c0_11 = arith.constant 0 : index
    %54 = vector.load %arg3[%c0_10, %c0_11] : memref<64x256xf32, #tpu.memory_space<vmem>>, vector<64x256xf32>
    tpu.vector_store %arg3[%c0_10, %c0_11], %53 {strides = array<i32>} : memref<64x256xf32, #tpu.memory_space<vmem>>, vector<64x256xf32>,
    return
  }
  func.func @transform_0(%arg0: i32) -> (i32, i32) {
    %c0_i32 = arith.constant 0 : i32
    %c0_i32_0 = arith.constant 0 : i32
    %c0_i32_1 = arith.constant 0 : i32
    return %c0_i32, %c0_i32_0 : i32, i32
  }
  func.func @transform_1(%arg0: i32) -> (i32, i32) {
    %c0_i32 = arith.constant 0 : i32
    %c0_i32_0 = arith.constant 0 : i32
    %c0_i32_1 = arith.constant 0 : i32
    return %c0_i32, %c0_i32_0 : i32, i32
  }
  func.func @transform_2(%arg0: i32) -> (i32, i32) {
    %c0_i32 = arith.constant 0 : i32
    %c0_i32_0 = arith.constant 0 : i32
    %c0_i32_1 = arith.constant 0 : i32
    return %c0_i32, %c0_i32_0 : i32, i32
  }
}

</mosaic_0001>

<bundles_post_ra>
// kernel: temporal_conv_forward.1
= control target key start
LH: loop header
LB: loop body
LE: loop exit
PB: predicated region body
PF: predicated region fallthrough
CT: control target
= control target key end

     0   :  { %s642_s11 = smov 32   ;;  %vm23_vm0 = vcmask 261120   ;;  %s643_s14 = smov 64   ;;  %v647_v26 = vmov 0.0   ;;  %vm41_vm1 = vcmask 916480   ;;  %vm52_vm2 = vcmask 785408   ;;  %s933_s0 = inlined_call_operand.vmem [shape: f32[8,256], index: 0, kind: input, shape index: {}]   ;;  %s934_s1 = inlined_call_operand.vmem [shape: f32[32,22], index: 1, kind: input, shape index: {}]   ;;  %s935_s2 = inlined_call_operand.vmem [shape: f32[64,256], index: 2, kind: output, shape index: {}]  }
   0x1   :  { %v15_v0 = vld [vmem:[%s933_s0] sm:$0xff]  ;;  %v16_v2 = vld [vmem:[%s933_s0 + $0x8] sm:$0xff]  ;;  %s644_s15 = smov 96   ;;  %s645_s0 = smov 112   ;;  %163 = vmatprep.mubr.f32.mxu0 %v647_v26  ;;  %315 = vmatprep.mubr.f32.mxu1 %v647_v26  ;;  %vm63_vm3 = vcmask 654336   ;;  %vm77_vm4 = vcmask 1043456  }
   0x2   :  { %19 = vrot.lane.b32.xlu0 %v15_v0, %s642_s11  ;;  %v188_v1 = vrot.slane %v15_v0, 4  ;;  %v189_v3 = vrot.slane %v16_v2, 4  ;;  %s646_s16 = smov 80   ;;  %vm74_vm5 = vcmask 523264   ;;  %vm82_vm6 = vcmask 162816  }
   0x4   :  { %190 = vrot.lane.b32.xlu1 %v188_v1, %s642_s11 }
   0x6   :  { %21 = vrot.lane.b32.xlu0 %v16_v2, %s642_s11 }
   0x8   :  { %192 = vrot.lane.b32.xlu1 %v189_v3, %s642_s11 }
  0x74   :  { %v20_v4 = vpop.permute.xlu0 %19 }
  0x75   :  { %v684_v17 = vsel %vm23_vm0, 0.0, %v20_v4 }
  0x76   :  { %v191_v5 = vpop.permute.xlu1 %190  ;;  %v32_v23 = vrot.slane %v684_v17, 4 }
  0x77   :  { %v676_v14 = vsel %vm23_vm0, 0.0, %v191_v5 }
  0x78   :  { %v22_v6 = vpop.permute.xlu0 %21  ;;  %v605_v20 = vpack.i.bf16 %v676_v14, %v684_v17  ;;  %v202_v21 = vrot.slane %v676_v14, 4 }
  0x79   :  { %v24_v7 = vsel %vm23_vm0, %v20_v4, %v22_v6  ;;  %v29_v8 = vsel %vm23_vm0, %v22_v6, 0.0 }
  0x7a   :  { %v33_v9 = vrot.slane %v24_v7, 4  ;;  %72 = vrot.lane.b32.xlu0 %v29_v8, %s643_s14  ;;  %v34_v10 = vrot.slane %v29_v8, 4  ;;  %v585_v11 = vpack.i.bf16 %v29_v8, %v24_v7  ;;  %v193_v13 = vpop.permute.xlu1 %192  ;;  %v620_v25 = vpack.i.bf16 %v202_v21, %v32_v23  ;;  %v738_v23 = vld [vmem:[%s934_s1] sm:$0xff] }
  0x7b   :  { %v679_v15 = vsel %vm23_vm0, %v191_v5, %v193_v13  ;;  %v199_v16 = vsel %vm23_vm0, %v193_v13, 0.0 }
  0x7c   :  { %586 = vrot.lane.b32.xlu1 %v585_v11, %s644_s15  ;;  %v590_v12 = vpack.i.bf16 %v34_v10, %v33_v9  ;;  %v203_v18 = vrot.slane %v679_v15, 4  ;;  %v204_v19 = vrot.slane %v199_v16, 4  ;;  %v600_v22 = vpack.i.bf16 %v199_v16, %v679_v15 }
  0x7e   :  { %591 = vrot.lane.b32.xlu0 %v590_v12, %s645_s0  ;;  %v610_v24 = vpack.i.bf16 %v204_v19, %v203_v18 }
  0x80   :  { %70 = vrot.lane.b32.xlu1 %v24_v7, %s643_s14 }
  0x82   :  { %596 = vrot.lane.b32.xlu0 %v590_v12, %s646_s16 }
  0x84   :  { %606 = vrot.lane.b32.xlu1 %v605_v20, %s644_s15 }
  0x86   :  { %601 = vrot.lane.b32.xlu0 %v600_v22, %s644_s15 }
  0x88   :  { %611 = vrot.lane.b32.xlu1 %v610_v24, %s645_s0 }
  0x8a   :  { %621 = vrot.lane.b32.xlu0 %v620_v25, %s645_s0 }
  0x8c   :  { %616 = vrot.lane.b32.xlu1 %v610_v24, %s646_s16 }
  0x8e   :  { %626 = vrot.lane.b32.xlu0 %v620_v25, %s646_s16  ;;  %v753_v25 = vld [vmem:[%s934_s1 + $0x8] sm:$0xff] }
  0x90   :  { %237 = vrot.lane.b32.xlu1 %v679_v15, %s643_s14 }
  0x92   :  { %239 = vrot.lane.b32.xlu0 %v199_v16, %s643_s14 }
  0x94   :  { %68 = vrot.lane.b32.xlu1 %v684_v17, %s643_s14 }
  0x96   :  { %235 = vrot.lane.b32.xlu0 %v676_v14, %s643_s14 }
  0xec   :  { %v701_v27 = vpop.permute.xlu0 %72 }
  0xee   :  { %v587_v28 = vpop.permute.xlu1 %586 }
  0xef   :  { %v589_v33 = vunpack.i.h.bf16 %v587_v28  ;;  %v588_v34 = vunpack.i.l.bf16 %v587_v28  ;;  %v774_v28 = vld [vmem:[%s934_s1 + $0x18] sm:$0xff] }
  0xf0   :  { %v592_v29 = vpop.permute.xlu0 %591 }
  0xf1   :  { %v594_v30 = vunpack.i.h.bf16 %v592_v29  ;;  %v593_v31 = vunpack.i.l.bf16 %v592_v29  ;;  %v54_v40 = vsel %vm52_vm2, %v588_v34, %v589_v33 }
  0xf2   :  { %v703_v32 = vpop.permute.xlu1 %70 }
  0xf3   :  { %v43_v38 = vsel %vm41_vm1, %v593_v31, %v594_v30  ;;  %v76_v20 = vsel %vm74_vm5, %v703_v32, %v701_v27  ;;  %v763_v27 = vld [vmem:[%s934_s1 + $0x10] sm:$0xff]  ;;  %s649_s1 = smov 1  }
  0xf4   :  { %v597_v35 = vpop.permute.xlu0 %596  ;;  %v79_v43 = vsel %vm77_vm4, %v24_v7, %v43_v38 }
  0xf5   :  { %v599_v36 = vunpack.i.h.bf16 %v597_v35  ;;  %v598_v37 = vunpack.i.l.bf16 %v597_v35 }
  0xf6   :  { %v607_v39 = vpop.permute.xlu1 %606 }
  0xf7   :  { %v65_v41 = vsel %vm63_vm3, %v598_v37, %v599_v36  ;;  %v608_v54 = vunpack.i.l.bf16 %v607_v39  ;;  %v609_v59 = vunpack.i.h.bf16 %v607_v39 }
  0xf8   :  { %v602_v42 = vpop.permute.xlu0 %601  ;;  %v81_v44 = vsel %vm77_vm4, %v54_v40, %v65_v41 }
  0xf9   :  { %v568_v45 = vpack.c.bf16 %v81_v44, %v79_v43  ;;  %v604_v49 = vunpack.i.h.bf16 %v602_v42  ;;  %v603_v50 = vunpack.i.l.bf16 %v602_v42  ;;  %v53_v6 = vsel %vm52_vm2, %v608_v54, %v588_v34 }
  0xfa   :  { %v612_v46 = vpop.permute.xlu1 %611 }
  0xfb   :  { %v614_v47 = vunpack.i.h.bf16 %v612_v46  ;;  %v613_v48 = vunpack.i.l.bf16 %v612_v46  ;;  %569 = vmatprep.subr.bf16.mxu0 %v568_v45  ;;  %v222_v61 = vsel %vm52_vm2, %v603_v50, %v604_v49  ;;  %v221_v9 = vsel %vm52_vm2, %v609_v59, %v603_v50 }
  0xfc   :  { %v622_v51 = vpop.permute.xlu0 %621 }
  0xfd   :  { %v624_v52 = vunpack.i.h.bf16 %v622_v51  ;;  %v623_v53 = vunpack.i.l.bf16 %v622_v51  ;;  %v212_v58 = vsel %vm41_vm1, %v613_v48, %v614_v47 }
  0xfe   :  { %v617_v55 = vpop.permute.xlu1 %616  ;;  %v244_v4 = vsel %vm77_vm4, %v679_v15, %v212_v58 }
  0xff   :  { %v619_v56 = vunpack.i.h.bf16 %v617_v55  ;;  %v618_v57 = vunpack.i.l.bf16 %v617_v55  ;;  %v42_v62 = vsel %vm41_vm1, %v623_v53, %v593_v31  ;;  %v211_v2 = vsel %vm41_vm1, %v624_v52, %v613_v48 }
 0x100   :  { %v627_v60 = vpop.permute.xlu0 %626  ;;  %v78_v12 = vsel %vm77_vm4, %v684_v17, %v42_v62  ;;  %v243_v15 = vsel %vm77_vm4, %v676_v14, %v211_v2 }
 0x101   :  { %v629_v63 = vunpack.i.h.bf16 %v627_v60  ;;  %v628_v0 = vunpack.i.l.bf16 %v627_v60  ;;  %v232_v1 = vsel %vm63_vm3, %v618_v57, %v619_v56 }
 0x102   :  { %v238_v3 = vpop.permute.xlu1 %237  ;;  %v246_v5 = vsel %vm77_vm4, %v222_v61, %v232_v1 }
 0x103   :  { %v572_v7 = vpack.c.bf16 %v246_v5, %v244_v4  ;;  %v64_v8 = vsel %vm63_vm3, %v628_v0, %v598_v37  ;;  %v231_v10 = vsel %vm63_vm3, %v629_v63, %v618_v57 }
 0x104   :  { %v240_v11 = vpop.permute.xlu0 %239  ;;  %v80_v13 = vsel %vm77_vm4, %v53_v6, %v64_v8  ;;  %v245_v16 = vsel %vm77_vm4, %v221_v9, %v231_v10 }
 0x105   :  { %573 = vmatprep.subr.bf16.mxu1 %v572_v7  ;;  %v570_v18 = vpack.c.bf16 %v80_v13, %v78_v12  ;;  %v574_v19 = vpack.c.bf16 %v245_v16, %v243_v15  ;;  %v242_v21 = vsel %vm74_vm5, %v238_v3, %v240_v11  ;;  %v648_v12 = vmov 20  }
 0x106   :  { %v69_v22 = vpop.permute.xlu1 %68  ;;  %631 = vset.pattern.permute.xlu0 %v648_v12  ;;  %630 = vset.pattern.permute.xlu1 %v648_v12 }
 0x107   :  { %571 = vmatpush1.bf16.msra.mxu0 %v570_v18  ;;  %575 = vmatpush1.bf16.msra.mxu1 %v574_v19  ;;  %v75_v24 = vsel %vm74_vm5, %v69_v22, %v703_v32 }
 0x108   :  { %v236_v17 = vpop.permute.xlu0 %235  ;;  %556 = vmatprep.subr.msk.mxu0 %vm77_vm4, %v76_v20  ;;  %562 = vmatprep.subr.msk.mxu1 %vm77_vm4, %v242_v21 }
 0x109   :  { %v241_v14 = vsel %vm74_vm5, %v236_v17, %v238_v3 }
 0x10b   :  { %557 = vmatpush1.msk.msra.mxu0 %vm77_vm4, %v75_v24  ;;  %563 = vmatpush1.msk.msra.mxu1 %vm77_vm4, %v241_v14 }
 0x10c   :  { %558 = vmatmul.mubr.msk.f32.vlgmr.msra.gmra.mrb[0].mxu0 %vm82_vm6, %v738_v23  ;;  %564 = vmatmul.mubr.msk.f32.vlgmr.msra.gmra.mrb[0].mxu1 %vm82_vm6, %v738_v23 }
 0x10d   :  { %321 = vmatprep.mubr.f32.mxu1 %v647_v26  ;;  %169 = vmatprep.mubr.f32.mxu0 %v647_v26 }
 0x110   :  { %565 = vmatmul.mubr.msk.f32.gmra.mrb[2].mxu1 %vm82_vm6, %v753_v25  ;;  %559 = vmatmul.mubr.msk.f32.gmra.mrb[2].mxu0 %vm82_vm6, %v753_v25 }
 0x111   :  { %175 = vmatprep.mubr.f32.mxu0 %v647_v26  ;;  %327 = vmatprep.mubr.f32.mxu1 %v647_v26 }
 0x114   :  { %560 = vmatmul.mubr.msk.f32.gmra.mrb[4].mxu0 %vm82_vm6, %v763_v27  ;;  %566 = vmatmul.mubr.msk.f32.gmra.mrb[4].mxu1 %vm82_vm6, %v763_v27 }
 0x115   :  { %181 = vmatprep.mubr.f32.mxu0 %v647_v26  ;;  %333 = vmatprep.mubr.f32.mxu1 %v647_v26 }
 0x118   :  { %561 = vmatmul.mubr.msk.f32.gmra.mrb[6].mxu0 %vm82_vm6, %v774_v28  ;;  %567 = vmatmul.mubr.msk.f32.gmra.mrb[6].mxu1 %vm82_vm6, %v774_v28 }
 0x1df   :  { %v781_v29 = vpop.f32.mrb[0].mxu0  ;;  %v783_v30 = vpop.f32.mrb[0].mxu1 }
 0x1e0   :  { %v785_v31 = vpop.f32.mrb[1].mxu0  ;;  %v787_v32 = vpop.f32.mrb[1].mxu1  ;;  %v364_v33 = vmul.f32 %v781_v29, %v781_v29  ;;  %v372_v26 = vmul.f32 %v783_v30, %v783_v30 }
 0x1e1   :  { %v352_v34 = vadd.f32 %v787_v32, %v783_v30  ;;  %v340_v35 = vadd.f32 %v785_v31, %v781_v29  ;;  %v365_v36 = vmul.f32 %v785_v31, %v785_v31  ;;  %v373_v37 = vmul.f32 %v787_v32, %v787_v32 }
 0x1e3   :  { %353 = vadd.xlane.f32.xlu0 %v352_v34  ;;  %v801_v38 = vpop.f32.mrb[2].mxu1  ;;  %341 = vadd.xlane.f32.xlu1 %v340_v35  ;;  %v803_v39 = vpop.f32.mrb[2].mxu0  ;;  %v380_v40 = vadd.f32 %v365_v36, %v364_v33  ;;  %v392_v41 = vadd.f32 %v373_v37, %v372_v26 }
 0x1e4   :  { %v805_v42 = vpop.f32.mrb[3].mxu1  ;;  %v807_v43 = vpop.f32.mrb[3].mxu0  ;;  %v366_v44 = vmul.f32 %v803_v39, %v803_v39  ;;  %v374_v45 = vmul.f32 %v801_v38, %v801_v38 }
 0x1e5   :  { %v355_v46 = vadd.f32 %v805_v42, %v801_v38  ;;  %v367_v47 = vmul.f32 %v807_v43, %v807_v43  ;;  %v343_v48 = vadd.f32 %v807_v43, %v803_v39  ;;  %v375_v49 = vmul.f32 %v805_v42, %v805_v42 }
 0x1e7   :  { %381 = vadd.xlane.f32.xlu0 %v380_v40  ;;  %356 = vadd.xlane.f32.xlu1 %v355_v46  ;;  %v821_v50 = vpop.f32.mrb[4].mxu0  ;;  %v383_v51 = vadd.f32 %v367_v47, %v366_v44  ;;  %v823_v52 = vpop.f32.mrb[4].mxu1  ;;  %v395_v53 = vadd.f32 %v375_v49, %v374_v45 }
 0x1e8   :  { %v825_v54 = vpop.f32.mrb[5].mxu0  ;;  %v827_v55 = vpop.f32.mrb[5].mxu1  ;;  %v368_v56 = vmul.f32 %v821_v50, %v821_v50  ;;  %v376_v57 = vmul.f32 %v823_v52, %v823_v52 }
 0x1e9   :  { %v346_v58 = vadd.f32 %v825_v54, %v821_v50  ;;  %v358_v59 = vadd.f32 %v827_v55, %v823_v52  ;;  %v369_v60 = vmul.f32 %v825_v54, %v825_v54  ;;  %v377_v61 = vmul.f32 %v827_v55, %v827_v55 }
 0x1eb   :  { %384 = vadd.xlane.f32.xlu1 %v383_v51  ;;  %344 = vadd.xlane.f32.xlu0 %v343_v48  ;;  %v841_v62 = vpop.f32.mrb[6].mxu0  ;;  %v843_v63 = vpop.f32.mrb[6].mxu1  ;;  %v386_v0 = vadd.f32 %v369_v60, %v368_v56  ;;  %v398_v1 = vadd.f32 %v377_v61, %v376_v57 }
 0x1ec   :  { %v845_v2 = vpop.f32.mrb[7].mxu0  ;;  %v847_v3 = vpop.f32.mrb[7].mxu1  ;;  %v370_v4 = vmul.f32 %v841_v62, %v841_v62  ;;  %v378_v5 = vmul.f32 %v843_v63, %v843_v63 }
 0x1ed   :  { %v371_v6 = vmul.f32 %v845_v2, %v845_v2  ;;  %v379_v7 = vmul.f32 %v847_v3, %v847_v3  ;;  %v349_v8 = vadd.f32 %v845_v2, %v841_v62  ;;  %v361_v9 = vadd.f32 %v847_v3, %v843_v63 }
 0x1ef   :  { %396 = vadd.xlane.f32.xlu1 %v395_v53  ;;  %393 = vadd.xlane.f32.xlu0 %v392_v41  ;;  %v389_v10 = vadd.f32 %v371_v6, %v370_v4  ;;  %v401_v11 = vadd.f32 %v379_v7, %v378_v5 }
 0x1f3   :  { %347 = vadd.xlane.f32.xlu0 %v346_v58  ;;  %350 = vadd.xlane.f32.xlu1 %v349_v8 }
 0x1f7   :  { %359 = vadd.xlane.f32.xlu0 %v358_v59  ;;  %362 = vadd.xlane.f32.xlu1 %v361_v9 }
 0x1fb   :  { %387 = vadd.xlane.f32.xlu0 %v386_v0  ;;  %390 = vadd.xlane.f32.xlu1 %v389_v10 }
 0x1ff   :  { %399 = vadd.xlane.f32.xlu0 %v398_v1  ;;  %402 = vadd.xlane.f32.xlu1 %v401_v11 }
 0x270   :  { %v354_v13 = vpop.xlane.xlu0 %353  ;;  %v342_v15 = vpop.xlane.xlu1 %341 }
 0x271   :  { %v404_v19 = vadd.f32 %v354_v13, %v342_v15 }
 0x273   :  { %v412_v17 = vmul.f32 0.001953125, %v404_v19 }
 0x274   :  { %v382_v16 = vpop.xlane.xlu0 %381  ;;  %v357_v18 = vpop.xlane.xlu1 %356 }
 0x275   :  { %v420_v35 = vmul.f32 %v412_v17, %v412_v17 }
 0x278   :  { %v385_v20 = vpop.xlane.xlu1 %384  ;;  %v345_v21 = vpop.xlane.xlu0 %344 }
 0x279   :  { %v405_v22 = vadd.f32 %v357_v18, %v345_v21 }
 0x27b   :  { %v413_v14 = vmul.f32 0.001953125, %v405_v22 }
 0x27c   :  { %v397_v24 = vpop.xlane.xlu1 %396  ;;  %v394_v33 = vpop.xlane.xlu0 %393 }
 0x27d   :  { %v409_v26 = vadd.f32 %v397_v24, %v385_v20  ;;  %v408_v34 = vadd.f32 %v394_v33, %v382_v16  ;;  %v421_v36 = vmul.f32 %v413_v14, %v413_v14 }
 0x27f   :  { %v417_v37 = vmul.f32 0.001953125, %v409_v26  ;;  %v416_v40 = vmul.f32 0.001953125, %v408_v34 }
 0x280   :  { %v348_v41 = vpop.xlane.xlu0 %347  ;;  %v351_v44 = vpop.xlane.xlu1 %350 }
 0x281   :  { %v425_v45 = vsub.f32 %v417_v37, %v421_v36  ;;  %v424_v46 = vsub.f32 %v416_v40, %v420_v35 }
 0x283   :  { %v429_v47 = vadd.f32 1e-05, %v425_v45  ;;  %v428_v48 = vadd.f32 1e-05, %v424_v46 }
 0x284   :  { %v360_v49 = vpop.xlane.xlu0 %359  ;;  %v363_v51 = vpop.xlane.xlu1 %362 }
 0x285   :  { %634 = vrsqrt.f32 %v429_v47  ;;  %v406_v53 = vadd.f32 %v360_v49, %v348_v41  ;;  %v407_v56 = vadd.f32 %v363_v51, %v351_v44 }
 0x286   :  { %636 = vrsqrt.f32 %v428_v48 }
 0x287   :  { %v414_v59 = vmul.f32 0.001953125, %v406_v53  ;;  %v415_v60 = vmul.f32 0.001953125, %v407_v56 }
 0x288   :  { %v388_v57 = vpop.xlane.xlu0 %387  ;;  %v391_v58 = vpop.xlane.xlu1 %390 }
 0x289   :  { %v422_v6 = vmul.f32 %v414_v59, %v414_v59  ;;  %v423_v7 = vmul.f32 %v415_v60, %v415_v60 }
 0x28c   :  { %v400_v61 = vpop.xlane.xlu0 %399  ;;  %v403_v0 = vpop.xlane.xlu1 %402 }
 0x28d   :  { %v410_v1 = vadd.f32 %v400_v61, %v388_v57  ;;  %v411_v4 = vadd.f32 %v403_v0, %v391_v58 }
 0x28f   :  { %v635_v5 = vpop.eup %634  ;;  %v418_v8 = vmul.f32 0.001953125, %v410_v1  ;;  %v419_v9 = vmul.f32 0.001953125, %v411_v4 }
 0x290   :  { %v637_v10 = vpop.eup %636  ;;  %v437_v11 = vmul.f32 %v635_v5, %v753_v25 }
 0x291   :  { %v426_v12 = vsub.f32 %v418_v8, %v422_v6  ;;  %v427_v13 = vsub.f32 %v419_v9, %v423_v7  ;;  %v436_v15 = vmul.f32 %v637_v10, %v738_v23 }
 0x292   :  { %v441_v16 = vmul.f32 %v437_v11, %v413_v14  ;;  %v650_v14 = vmov 21  }
 0x293   :  { %v430_v18 = vadd.f32 1e-05, %v426_v12  ;;  %v431_v19 = vadd.f32 1e-05, %v427_v13  ;;  %v440_v20 = vmul.f32 %v436_v15, %v412_v17 }
 0x294   :  { %450 = vrot.lane.b32.xlu1 %v441_v16, %s649_s1 }
 0x295   :  { %638 = vrsqrt.f32 %v430_v18  ;;  %448 = vrot.lane.b32.xlu0 %v440_v20, %s649_s1 }
 0x296   :  { %640 = vrsqrt.f32 %v431_v19 }
 0x29f   :  { %v639_v21 = vpop.eup %638 }
 0x2a0   :  { %v641_v22 = vpop.eup %640  ;;  %v438_v24 = vmul.f32 %v639_v21, %v763_v27 }
 0x2a1   :  { %v439_v33 = vmul.f32 %v641_v22, %v774_v28 }
 0x2a2   :  { %v442_v26 = vmul.f32 %v438_v24, %v414_v59 }
 0x2a3   :  { %v443_v34 = vmul.f32 %v439_v33, %v415_v60 }
 0x2a4   :  { %452 = vrot.lane.b32.xlu1 %v442_v26, %s649_s1 }
 0x2a5   :  { %454 = vrot.lane.b32.xlu0 %v443_v34, %s649_s1 }
 0x2a8   :  { %466 = vperm.xlu1 %630, %v436_v15  }
 0x2a9   :  { %471 = vperm.xlu0 %631, %v437_v11  }
 0x2ac   :  { %476 = vperm.xlu1 %630, %v438_v24  }
 0x2ad   :  { %632 = vset.pattern.permute.xlu0 %v650_v14 }
 0x2b0   :  { %481 = vperm.xlu1 %630, %v439_v33  }
 0x2b4   :  { %633 = vset.pattern.permute.xlu1 %v650_v14 }
 0x306   :  { %v451_v17 = vpop.permute.xlu1 %450 }
 0x307   :  { %v449_v35 = vpop.permute.xlu0 %448  ;;  %v461_v36 = vsub.f32 %v753_v25, %v451_v17 }
 0x308   :  { %v460_v37 = vsub.f32 %v738_v23, %v449_v35 }
 0x309   :  { %507 = vperm.xlu1 %633, %v461_v36  }
 0x30a   :  { %502 = vperm.xlu0 %632, %v460_v37  }
 0x316   :  { %v453_v40 = vpop.permute.xlu1 %452 }
 0x317   :  { %v455_v41 = vpop.permute.xlu0 %454  ;;  %v462_v44 = vsub.f32 %v763_v27, %v453_v40 }
 0x318   :  { %v463_v45 = vsub.f32 %v774_v28, %v455_v41 }
 0x319   :  { %512 = vperm.xlu1 %633, %v462_v44  }
 0x31a   :  { %517 = vperm.xlu0 %632, %v463_v45  }
 0x327   :  { %v467_v46 = vpop.permute.xlu1 %466 }
 0x328   :  { %v472_v48 = vpop.permute.xlu0 %471  ;;  %v484_v56 = vmul.f32 %v467_v46, %v781_v29  ;;  %v485_v27 = vmul.f32 %v467_v46, %v785_v31  ;;  %v492_v28 = vmul.f32 %v467_v46, %v783_v30  ;;  %v493_v57 = vmul.f32 %v467_v46, %v787_v32 }
 0x329   :  { %v486_v51 = vmul.f32 %v472_v48, %v803_v39  ;;  %v487_v25 = vmul.f32 %v472_v48, %v807_v43  ;;  %v494_v23 = vmul.f32 %v472_v48, %v801_v38  ;;  %v495_v53 = vmul.f32 %v472_v48, %v805_v42 }
 0x32b   :  { %v477_v47 = vpop.permute.xlu1 %476 }
 0x32c   :  { %v488_v29 = vmul.f32 %v477_v47, %v821_v50  ;;  %v489_v30 = vmul.f32 %v477_v47, %v825_v54  ;;  %v496_v31 = vmul.f32 %v477_v47, %v823_v52  ;;  %v497_v32 = vmul.f32 %v477_v47, %v827_v55 }
 0x32f   :  { %v482_v49 = vpop.permute.xlu1 %481 }
 0x330   :  { %v490_v42 = vmul.f32 %v482_v49, %v841_v62  ;;  %v491_v5 = vmul.f32 %v482_v49, %v845_v2  ;;  %v498_v6 = vmul.f32 %v482_v49, %v843_v63  ;;  %v499_v7 = vmul.f32 %v482_v49, %v847_v3 }
 0x388   :  { %v508_v58 = vpop.permute.xlu1 %507 }
 0x389   :  { %v503_v59 = vpop.permute.xlu0 %502  ;;  %v522_v60 = vadd.f32 %v508_v58, %v486_v51  ;;  %v523_v61 = vadd.f32 %v508_v58, %v487_v25  ;;  %v530_v0 = vadd.f32 %v508_v58, %v494_v23  ;;  %v531_v39 = vadd.f32 %v508_v58, %v495_v53 }
 0x38a   :  { %v520_v1 = vadd.f32 %v503_v59, %v484_v56  ;;  %v521_v43 = vadd.f32 %v503_v59, %v485_v27  ;;  %v528_v4 = vadd.f32 %v503_v59, %v492_v28  ;;  %v529_v38 = vadd.f32 %v503_v59, %v493_v57 }
 0x38b   :  { %538 = vst [vmem:[%s935_s2 + $0x10] sm:$0xff] %v522_v60  ;;  %539 = vst [vmem:[%s935_s2 + $0x18] sm:$0xff] %v523_v61 }
 0x38c   :  { %546 = vst [vmem:[%s935_s2 + $0x50] sm:$0xff] %v530_v0  ;;  %547 = vst [vmem:[%s935_s2 + $0x58] sm:$0xff] %v531_v39 }
 0x38d   :  { %536 = vst [vmem:[%s935_s2] sm:$0xff] %v520_v1  ;;  %537 = vst [vmem:[%s935_s2 + $0x8] sm:$0xff] %v521_v43 }
 0x38e   :  { %544 = vst [vmem:[%s935_s2 + $0x40] sm:$0xff] %v528_v4  ;;  %545 = vst [vmem:[%s935_s2 + $0x48] sm:$0xff] %v529_v38 }
 0x398   :  { %v513_v8 = vpop.permute.xlu1 %512 }
 0x399   :  { %v518_v9 = vpop.permute.xlu0 %517  ;;  %v524_v10 = vadd.f32 %v513_v8, %v488_v29  ;;  %v525_v11 = vadd.f32 %v513_v8, %v489_v30  ;;  %v532_v12 = vadd.f32 %v513_v8, %v496_v31  ;;  %v533_v50 = vadd.f32 %v513_v8, %v497_v32 }
 0x39a   :  { %v526_v13 = vadd.f32 %v518_v9, %v490_v42  ;;  %v527_v54 = vadd.f32 %v518_v9, %v491_v5  ;;  %v534_v15 = vadd.f32 %v518_v9, %v498_v6  ;;  %v535_v52 = vadd.f32 %v518_v9, %v499_v7 }
 0x39b   :  { %540 = vst [vmem:[%s935_s2 + $0x20] sm:$0xff] %v524_v10  ;;  %541 = vst [vmem:[%s935_s2 + $0x28] sm:$0xff] %v525_v11 }
 0x39c   :  { %548 = vst [vmem:[%s935_s2 + $0x60] sm:$0xff] %v532_v12  ;;  %549 = vst [vmem:[%s935_s2 + $0x68] sm:$0xff] %v533_v50 }
 0x39d   :  { %542 = vst [vmem:[%s935_s2 + $0x30] sm:$0xff] %v526_v13  ;;  %543 = vst [vmem:[%s935_s2 + $0x38] sm:$0xff] %v527_v54 }
 0x39e   :  { %550 = vst [vmem:[%s935_s2 + $0x70] sm:$0xff] %v534_v15  ;;  %551 = vst [vmem:[%s935_s2 + $0x78] sm:$0xff] %v535_v52 }

</bundles_post_ra>
